<compile_context>
chip_gen: v7x
topology: tpu7x:2x2x1
jax: 0.10.0
libtpu: 0.0.40
codegen_flags: <defaults>
</compile_context>

<pallas_src>
import jax
import jax.numpy as jnp
from jax.experimental import pallas as pl
from jax.experimental.pallas import tpu as pltpu

_LANE = 128        # lane width: hidden/output feature dims padded to this
_BATCH_ALIGN = 16  # bf16 activations: keep batch-tile a multiple of 16 sublanes


def _round_up(n, m):
    return ((n + m - 1) // m) * m


# --------------------------------------------------------------------------
# Kernel
# --------------------------------------------------------------------------
def _dqn_kernel(x_ref, w1_ref, ws_ref, bs_ref, out_ref):
    """Fused 4-layer MLP on one batch tile: (Linear+ReLU) x3 -> Linear.

    x_ref  : (TB, input_size) bf16   (unpadded feature dim)
    w1_ref : (input_size, D)  bf16
    ws_ref : (3, D, D)        bf16   (fc2, fc3, fc4 zero-padded + stacked)
    bs_ref : (4, D)           f32    (all biases, zero-padded)
    out_ref: (TB, D)          bf16
    """
    wdt = w1_ref.dtype

    # fc1 + ReLU  (bf16 MXU inputs, f32 accumulate, f32 elementwise on VPU).
    h = jnp.dot(x_ref[...], w1_ref[...], preferred_element_type=jnp.float32)
    h = jnp.maximum(h + bs_ref[pl.ds(0, 1), :], 0.0)
    # TODO(synk): training-mode Dropout(p=0.2) omitted; eval mode == identity.

    # fc2 + ReLU, fc3 + ReLU, fc4 (no activation), from the stacked weights.
    for layer in range(3):
        h = jnp.dot(h.astype(wdt), ws_ref[layer],
                    preferred_element_type=jnp.float32)
        h = h + bs_ref[pl.ds(layer + 1, 1), :]
        if layer < 2:
            h = jnp.maximum(h, 0.0)

    out_ref[...] = h.astype(out_ref.dtype)


# --------------------------------------------------------------------------
# Parameter init / packing
# --------------------------------------------------------------------------
def init_params(key, input_size, hidden_size, output_size):
    """Deterministic f32 init mimicking nn.Linear (uniform +-1/sqrt(fan_in)).

    Weights are (in_features, out_features), transposed vs PyTorch, so the
    kernel computes y = x @ W + b directly.
    """
    dims = [
        (input_size, hidden_size * 2),       # fc1
        (hidden_size * 2, hidden_size * 2),  # fc2
        (hidden_size * 2, hidden_size),      # fc3
        (hidden_size, output_size),          # fc4
    ]
    params = {}
    for i, (fan_in, fan_out) in enumerate(dims, start=1):
        key, kw, kb = jax.random.split(key, 3)
        bound = 1.0 / jnp.sqrt(jnp.float32(fan_in))
        params[f"w{i}"] = jax.random.uniform(
            kw, (fan_in, fan_out), jnp.float32, -bound, bound)
        params[f"b{i}"] = jax.random.uniform(
            kb, (fan_out,), jnp.float32, -bound, bound)
    return params


def prepare_params(params, weight_dtype=jnp.bfloat16):
    """Pack the 4 Linear layers for the kernel.

    * fc1 keeps its real fan_in (input_size), only fan_out is padded to D, so
      the activation input needs no lane padding in HBM.
    * fc2..fc4 are zero-padded to a common (D, D) square and stacked into one
      (3, D, D) bf16 array -> a single resident weight DMA stream.
    * All 4 biases are stacked into one (4, D) f32 array.
    Zero-padded rows/cols are numerically inert through ReLU.
    """
    din = params["w1"].shape[0]
    dims_out = [params[f"w{i}"].shape[1] for i in range(1, 5)]
    dims_in = [params[f"w{i}"].shape[0] for i in range(2, 5)]
    D = _round_up(max(dims_out + dims_in), _LANE)

    w1 = jnp.zeros((din, D), weight_dtype)
    w1 = w1.at[:, :dims_out[0]].set(params["w1"].astype(weight_dtype))

    ws = jnp.zeros((3, D, D), weight_dtype)
    for k, i in enumerate(range(2, 5)):
        w = params[f"w{i}"]
        fi, fo = w.shape
        ws = ws.at[k, :fi, :fo].set(w.astype(weight_dtype))

    bs = jnp.zeros((4, D), jnp.float32)
    for i in range(1, 5):
        b = params[f"b{i}"]
        bs = bs.at[i - 1, :b.shape[0]].set(b)

    return {"w1": w1, "ws": ws, "bs": bs, "input_size": din, "D": D}


# --------------------------------------------------------------------------
# Wrapper
# --------------------------------------------------------------------------
def _pick_batch_tile(B, max_tile):
    """Balanced batch tile: never more than ~1 tile of padding waste, and at
    least 2 grid steps for large B so both v7x TensorCores get work."""
    n_tiles = pl.cdiv(B, max_tile)
    if B > 512:
        n_tiles = max(n_tiles, 2)
    return _round_up(pl.cdiv(B, n_tiles), _BATCH_ALIGN)


def _xla_forward(x, prep, output_size):
    """Plain-XLA path for the launch-overhead-dominated tiny-batch regime."""
    h = jnp.dot(x.astype(jnp.bfloat16), prep["w1"],
                preferred_element_type=jnp.float32) + prep["bs"][0]
    h = jnp.maximum(h, 0.0)
    for layer in range(3):
        h = jnp.dot(h.astype(jnp.bfloat16), prep["ws"][layer],
                    preferred_element_type=jnp.float32) + prep["bs"][layer + 1]
        if layer < 2:
            h = jnp.maximum(h, 0.0)
    return h[:, :output_size].astype(jnp.bfloat16).astype(jnp.float32)


def dqn_forward(x, prep, output_size, *, max_batch_tile=2048,
                xla_small_batch=False):
    """Run the fused MLP. x: (B, input_size) or (input_size,) float32."""
    if x.ndim == 1:
        x = x[None, :]  # mirrors PyTorch unsqueeze(0)
    B, din = x.shape
    assert din == prep["input_size"], (din, prep["input_size"])
    D = prep["D"]

    if xla_small_batch and B <= 64:
        # Acting path: fixed launch + ~100 KiB weight-DMA cost dominates;
        # in-kernel tuning cannot help there (perf-review item #10).
        return _xla_forward(x, prep, output_size)

    tb = _pick_batch_tile(B, max_batch_tile)
    b_pad = _round_up(B, tb)

    # bf16 activations halve the dominant HBM stream; feature dim stays at the
    # real input_size (no 128-lane zero pad materialized in HBM).
    x_bf = x.astype(jnp.bfloat16)
    if b_pad != B:
        x_bf = jnp.pad(x_bf, ((0, b_pad - B), (0, 0)))

    grid = (b_pad // tb,)
    act_map = lambda i: (i, 0)          # batch-tiled activations / output

    flops = 2 * b_pad * (din * D + 3 * D * D)
    bytes_accessed = (b_pad * din * 2          # x (bf16)
                      + din * D * 2            # w1 (bf16)
                      + 3 * D * D * 2          # stacked weights (bf16)
                      + 4 * D * 4              # stacked biases (f32)
                      + b_pad * D * 2)         # output (bf16)

    out_pad = pl.pallas_call(
        _dqn_kernel,
        out_shape=jax.ShapeDtypeStruct((b_pad, D), jnp.bfloat16),
        grid=grid,
        in_specs=[
            pl.BlockSpec((tb, din), act_map),
            # Weights / biases: constant index maps -> resident in VMEM while
            # activation tiles pipeline across the grid.
            pl.BlockSpec(prep["w1"].shape, lambda i: (0, 0)),
            pl.BlockSpec(prep["ws"].shape, lambda i: (0, 0, 0)),
            pl.BlockSpec(prep["bs"].shape, lambda i: (0, 0)),
        ],
        out_specs=pl.BlockSpec((tb, D), act_map),
        compiler_params=pltpu.CompilerParams(
            dimension_semantics=("parallel",)),
        cost_estimate=pl.CostEstimate(
            flops=flops, transcendentals=0, bytes_accessed=bytes_accessed),
    )(x_bf, prep["w1"], prep["ws"], prep["bs"])

    # Slice off padded rows / lanes; return f32 Q-values (nn.Linear dtype).
    return out_pad[:B, :output_size].astype(jnp.float32)


# --------------------------------------------------------------------------
# Pure-JAX reference (matching numerics: bf16 MXU inputs, f32 accumulate)
# --------------------------------------------------------------------------
def reference_forward(x, params, weight_dtype=jnp.bfloat16):
    if x.ndim == 1:
        x = x[None, :]
    h = x.astype(jnp.float32)
    for i in range(1, 5):
        w = params[f"w{i}"].astype(weight_dtype)
        b = params[f"b{i}"]
        h = jnp.dot(h.astype(weight_dtype), w,
                    preferred_element_type=jnp.float32) + b
        if i < 4:
            h = jnp.maximum(h, 0.0)
    return h


if __name__ == "__main__":
    # Shapes consistent with the module: input_size=16, hidden_size=32,
    # output_size=8, batch=2.
    input_size, hidden_size, output_size = 16, 32, 8
    batch = 2

    key = jax.random.PRNGKey(0)
    key, kx, kx2 = jax.random.split(key, 3)
    params = init_params(key, input_size, hidden_size, output_size)
    prep = prepare_params(params)

    # Small batch path.
    x = jax.random.normal(kx, (batch, input_size), jnp.float32)
    out = jax.block_until_ready(dqn_forward(x, prep, output_size))
    ref = reference_forward(x, params)
    assert out.shape == (batch, output_size), out.shape
    assert jnp.allclose(out, ref, atol=2e-2, rtol=2e-2), "mismatch (batch=2)"

    # 1-D input path (unsqueeze(0) semantics).
    out1 = jax.block_until_ready(dqn_forward(x[0], prep, output_size))
    assert out1.shape == (1, output_size)
    assert jnp.allclose(out1, ref[:1], atol=2e-2, rtol=2e-2), "mismatch (1-D)"

    # Multi-tile path: uneven batch with a small tile cap to exercise the
    # balanced-tile selection and grid pipelining.
    x_big = jax.random.normal(kx2, (100, input_size), jnp.float32)
    out_big = jax.block_until_ready(
        dqn_forward(x_big, prep, output_size, max_batch_tile=32))
    ref_big = reference_forward(x_big, params)
    assert out_big.shape == (100, output_size)
    assert jnp.allclose(out_big, ref_big, atol=2e-2, rtol=2e-2), \
        "mismatch (batch=100)"

    print("KERNEL_OK")
</pallas_src>

<mosaic_0001>
module attributes {stable_mosaic.version = 11 : i64} {
  func.func @_dqn_kernel(%arg0: i32, %arg1: memref<16x16xbf16, #tpu.memory_space<vmem>>, %arg2: memref<16x128xbf16, #tpu.memory_space<vmem>>, %arg3: memref<3x128x128xbf16, #tpu.memory_space<vmem>>, %arg4: memref<4x128xf32, #tpu.memory_space<vmem>>, %arg5: memref<16x128xbf16, #tpu.memory_space<vmem>>) attributes {dimension_semantics = [#tpu.dimension_semantics<parallel>], iteration_bounds = array<i64: 1>, scalar_prefetch = 0 : i64, scratch_operands = 0 : i64, tpu.core_type = #tpu.core_type<tc>, window_params = [{transform_indices = @transform_0, window_bounds = array<i64: 16, 16>}, {pipeline_mode = #tpu.pipeline_mode<synchronous>, transform_indices = @transform_1, window_bounds = array<i64: 16, 128>}, {pipeline_mode = #tpu.pipeline_mode<synchronous>, transform_indices = @transform_2, window_bounds = array<i64: 3, 128, 128>}, {pipeline_mode = #tpu.pipeline_mode<synchronous>, transform_indices = @transform_3, window_bounds = array<i64: 4, 128>}, {transform_indices = @transform_4, window_bounds = array<i64: 16, 128>}]} {
    %c0 = arith.constant 0 : index
    %c0_0 = arith.constant 0 : index
    %0 = vector.load %arg1[%c0, %c0_0] : memref<16x16xbf16, #tpu.memory_space<vmem>>, vector<16x16xbf16>
    %c0_1 = arith.constant 0 : index
    %c0_2 = arith.constant 0 : index
    %1 = vector.load %arg2[%c0_1, %c0_2] : memref<16x128xbf16, #tpu.memory_space<vmem>>, vector<16x128xbf16>
    %cst = arith.constant dense<0.000000e+00> : vector<16x128xf32>
    %2 = tpu.matmul %0, %1, %cst {dimension_numbers = #tpu.dot_dimension_numbers<[1], [0], [0], [1], [0, 0, 1, 1], [], []>} : vector<16x16xbf16>, vector<16x128xbf16>, vector<16x128xf32> -> vector<16x128xf32>
    %c0_3 = arith.constant 0 : index
    %c0_4 = arith.constant 0 : index
    %3 = vector.load %arg4[%c0_3, %c0_4] : memref<4x128xf32, #tpu.memory_space<vmem>>, vector<1x128xf32>
    %4 = vector.broadcast %3 : vector<1x128xf32> to vector<16x128xf32>
    %5 = arith.addf %2, %4 : vector<16x128xf32>
    %cst_5 = arith.constant 0.000000e+00 : f32
    %6 = vector.broadcast %cst_5 : f32 to vector<16x128xf32>
    %7 = arith.maximumf %5, %6 : vector<16x128xf32>
    %8 = arith.truncf %7 : vector<16x128xf32> to vector<16x128xbf16>
    %c0_6 = arith.constant 0 : index
    %c0_7 = arith.constant 0 : index
    %c0_8 = arith.constant 0 : index
    %9 = vector.load %arg3[%c0_6, %c0_7, %c0_8] : memref<3x128x128xbf16, #tpu.memory_space<vmem>>, vector<1x128x128xbf16>
    %10 = vector.shape_cast %9 : vector<1x128x128xbf16> to vector<128x128xbf16>
    %cst_9 = arith.constant dense<0.000000e+00> : vector<16x128xf32>
    %11 = tpu.matmul %8, %10, %cst_9 {dimension_numbers = #tpu.dot_dimension_numbers<[1], [0], [0], [1], [0, 0, 1, 1], [], []>} : vector<16x128xbf16>, vector<128x128xbf16>, vector<16x128xf32> -> vector<16x128xf32>
    %c1 = arith.constant 1 : index
    %c0_10 = arith.constant 0 : index
    %12 = vector.load %arg4[%c1, %c0_10] : memref<4x128xf32, #tpu.memory_space<vmem>>, vector<1x128xf32>
    %13 = vector.broadcast %12 : vector<1x128xf32> to vector<16x128xf32>
    %14 = arith.addf %11, %13 : vector<16x128xf32>
    %cst_11 = arith.constant 0.000000e+00 : f32
    %15 = vector.broadcast %cst_11 : f32 to vector<16x128xf32>
    %16 = arith.maximumf %14, %15 : vector<16x128xf32>
    %17 = arith.truncf %16 : vector<16x128xf32> to vector<16x128xbf16>
    %c1_12 = arith.constant 1 : index
    %c0_13 = arith.constant 0 : index
    %c0_14 = arith.constant 0 : index
    %18 = vector.load %arg3[%c1_12, %c0_13, %c0_14] : memref<3x128x128xbf16, #tpu.memory_space<vmem>>, vector<1x128x128xbf16>
    %19 = vector.shape_cast %18 : vector<1x128x128xbf16> to vector<128x128xbf16>
    %cst_15 = arith.constant dense<0.000000e+00> : vector<16x128xf32>
    %20 = tpu.matmul %17, %19, %cst_15 {dimension_numbers = #tpu.dot_dimension_numbers<[1], [0], [0], [1], [0, 0, 1, 1], [], []>} : vector<16x128xbf16>, vector<128x128xbf16>, vector<16x128xf32> -> vector<16x128xf32>
    %c2 = arith.constant 2 : index
    %c0_16 = arith.constant 0 : index
    %21 = vector.load %arg4[%c2, %c0_16] : memref<4x128xf32, #tpu.memory_space<vmem>>, vector<1x128xf32>
    %22 = vector.broadcast %21 : vector<1x128xf32> to vector<16x128xf32>
    %23 = arith.addf %20, %22 : vector<16x128xf32>
    %cst_17 = arith.constant 0.000000e+00 : f32
    %24 = vector.broadcast %cst_17 : f32 to vector<16x128xf32>
    %25 = arith.maximumf %23, %24 : vector<16x128xf32>
    %26 = arith.truncf %25 : vector<16x128xf32> to vector<16x128xbf16>
    %c2_18 = arith.constant 2 : index
    %c0_19 = arith.constant 0 : index
    %c0_20 = arith.constant 0 : index
    %27 = vector.load %arg3[%c2_18, %c0_19, %c0_20] : memref<3x128x128xbf16, #tpu.memory_space<vmem>>, vector<1x128x128xbf16>
    %28 = vector.shape_cast %27 : vector<1x128x128xbf16> to vector<128x128xbf16>
    %cst_21 = arith.constant dense<0.000000e+00> : vector<16x128xf32>
    %29 = tpu.matmul %26, %28, %cst_21 {dimension_numbers = #tpu.dot_dimension_numbers<[1], [0], [0], [1], [0, 0, 1, 1], [], []>} : vector<16x128xbf16>, vector<128x128xbf16>, vector<16x128xf32> -> vector<16x128xf32>
    %c3 = arith.constant 3 : index
    %c0_22 = arith.constant 0 : index
    %30 = vector.load %arg4[%c3, %c0_22] : memref<4x128xf32, #tpu.memory_space<vmem>>, vector<1x128xf32>
    %31 = vector.broadcast %30 : vector<1x128xf32> to vector<16x128xf32>
    %32 = arith.addf %29, %31 : vector<16x128xf32>
    %33 = arith.truncf %32 : vector<16x128xf32> to vector<16x128xbf16>
    %c0_23 = arith.constant 0 : index
    %c0_24 = arith.constant 0 : index
    %34 = vector.load %arg5[%c0_23, %c0_24] : memref<16x128xbf16, #tpu.memory_space<vmem>>, vector<16x128xbf16>
    tpu.vector_store %arg5[%c0_23, %c0_24], %33 {strides = array<i32>} : memref<16x128xbf16, #tpu.memory_space<vmem>>, vector<16x128xbf16>,
    return
  }
  func.func @transform_0(%arg0: i32) -> (i32, i32) {
    %c0_i32 = arith.constant 0 : i32
    %c0_i32_0 = arith.constant 0 : i32
    return %arg0, %c0_i32 : i32, i32
  }
  func.func @transform_1(%arg0: i32) -> (i32, i32) {
    %c0_i32 = arith.constant 0 : i32
    %c0_i32_0 = arith.constant 0 : i32
    %c0_i32_1 = arith.constant 0 : i32
    return %c0_i32, %c0_i32_0 : i32, i32
  }
  func.func @transform_2(%arg0: i32) -> (i32, i32, i32) {
    %c0_i32 = arith.constant 0 : i32
    %c0_i32_0 = arith.constant 0 : i32
    %c0_i32_1 = arith.constant 0 : i32
    %c0_i32_2 = arith.constant 0 : i32
    return %c0_i32, %c0_i32_0, %c0_i32_1 : i32, i32, i32
  }
  func.func @transform_3(%arg0: i32) -> (i32, i32) {
    %c0_i32 = arith.constant 0 : i32
    %c0_i32_0 = arith.constant 0 : i32
    %c0_i32_1 = arith.constant 0 : i32
    return %c0_i32, %c0_i32_0 : i32, i32
  }
  func.func @transform_4(%arg0: i32) -> (i32, i32) {
    %c0_i32 = arith.constant 0 : i32
    %c0_i32_0 = arith.constant 0 : i32
    return %arg0, %c0_i32 : i32, i32
  }
}

</mosaic_0001>

<bundles_post_ra>
// kernel: tpu_custom_call.1
= control target key start
LH: loop header
LB: loop body
LE: loop exit
PB: predicated region body
PF: predicated region fallthrough
CT: control target
= control target key end

     0   :  { %9 = vsyncpa [#allocation3], 0  ;;  %s902_s0 = inlined_call_operand.hbm [shape: bf16[16,16], index: 0, kind: input, shape index: {}]   ;;  %s903_s1 = inlined_call_operand.hbm [shape: bf16[16,128], index: 1, kind: input, shape index: {}]   ;;  %s904_s2 = inlined_call_operand.hbm [shape: bf16[3,128,128], index: 2, kind: input, shape index: {}]   ;;  %s905_s3 = inlined_call_operand.vmem [shape: f32[4,128], index: 3, kind: input, shape index: {}]   ;;  %s906_s4 = inlined_call_operand.hbm [shape: bf16[16,128], index: 4, kind: output, shape index: {}]  }
   0x1   :  { %10 = vsyncpa [#allocation6], 0 }
   0x2   :  { %11 = vsyncpa [#allocation4], 0  ;;  %s757_s15 = smov [#allocation5]   ;;  %s758_s17 = smov [#allocation2]  }
   0x3   :  { %s29_s16 = sshll.u32 %s757_s15, 4  ;;  %s17_s18 = sshll.u32 %s758_s17, 4  ;;  %s30_s16 = int_to_ptr.vmem [resolvable:$true] %s29_s16  ;;  %s790_s18 = int_to_ptr.vmem [resolvable:$true] %s17_s18 }
   0x4   :  { %s663_s21 = scalar_lea.hbm %s903_s1, 128 }
   0x5   :  { %p664_p0 = scmp.ne.s32.totalorder %s903_s1, %s663_s21  ;;  %p667_p1 = scmp.lt.u32.totalorder %s663_s21, %s903_s1 }
   0x7   :  { %p669_p2 = pnand %p667_p1, %p664_p0 }
   0x9   :  { %672 = shalt.err (!%p669_p2)
}
   0xa   :  { %s673_s26 = scalar_lea.vmem %s30_s16, 128  ;;  %p678_p4 = scmp.lt.s32.totalorder %s30_s16, %s30_s16 }
   0xb   :  { %p674_p3 = scmp.ne.s32.totalorder %s30_s16, %s673_s26  ;;  %p679_p5 = scmp.lt.s32.totalorder %s673_s26, %s673_s26 }
   0xd   :  { %p680_p6 = por %p679_p5, %p678_p4 }
   0xf   :  { %p681_p7 = pnand %p680_p6, %p674_p3 }
  0x11   :  { %684 = shalt.err (!%p681_p7)
}
  0x12   :  { %s759_s27 = smov 64   ;;  %s760_s28 = smov 4  }
  0x13   :  { %35 = dma.hbm_to_vmem [thread:$0]  %s903_s1, 128, %s30_s16, [#allocation6], %s759_s27, %s759_s27, %s760_s28  }
  0x14   :  { %s685_s7 = scalar_lea.hbm %s902_s0, 128 }
  0x15   :  { %p686_p8 = scmp.ne.s32.totalorder %s902_s0, %s685_s7  ;;  %p689_p9 = scmp.lt.u32.totalorder %s685_s7, %s902_s0 }
  0x17   :  { %p691_p10 = pnand %p689_p9, %p686_p8 }
  0x19   :  { %694 = shalt.err (!%p691_p10)
}
  0x1a   :  { %s695_s12 = scalar_lea.vmem %s790_s18, 128  ;;  %p700_p12 = scmp.lt.s32.totalorder %s790_s18, %s790_s18 }
  0x1b   :  { %p696_p11 = scmp.ne.s32.totalorder %s790_s18, %s695_s12  ;;  %p701_p13 = scmp.lt.s32.totalorder %s695_s12, %s695_s12 }
  0x1d   :  { %p702_p0 = por %p701_p13, %p700_p12 }
  0x1f   :  { %p703_p1 = pnand %p702_p0, %p696_p11 }
  0x21   :  { %706 = shalt.err (!%p703_p1)
}
  0x22   :  { %23 = dma.hbm_to_vmem [thread:$0]  %s902_s0, 128, %s790_s18, [#allocation3], %s759_s27, %s759_s27, %s760_s28  }
  0x23   :  { %s761_s14 = smov [#allocation7]   ;;  %s707_s19 = scalar_lea.hbm %s904_s2, 3072 }
  0x24   :  { %s41_s15 = sshll.u32 %s761_s14, 4  ;;  %p708_p2 = scmp.ne.s32.totalorder %s904_s2, %s707_s19  ;;  %s42_s15 = int_to_ptr.vmem [resolvable:$true] %s41_s15 }
  0x25   :  { %p711_p3 = scmp.lt.u32.totalorder %s707_s19, %s904_s2 }
  0x27   :  { %p713_p4 = pnand %p711_p3, %p708_p2 }
  0x29   :  { %716 = shalt.err (!%p713_p4)
}
  0x2a   :  { %s717_s24 = scalar_lea.vmem %s42_s15, 3072  ;;  %p722_p6 = scmp.lt.s32.totalorder %s42_s15, %s42_s15 }
  0x2b   :  { %p718_p5 = scmp.ne.s32.totalorder %s42_s15, %s717_s24  ;;  %p723_p7 = scmp.lt.s32.totalorder %s717_s24, %s717_s24 }
  0x2d   :  { %p724_p8 = por %p723_p7, %p722_p6 }
  0x2f   :  { %p725_p9 = pnand %p724_p8, %p718_p5 }
  0x31   :  { %728 = shalt.err (!%p725_p9)
}
  0x32   :  { %47 = dma.hbm_to_vmem [thread:$0]  %s904_s2, 3072, %s42_s15, [#allocation6], %s759_s27, %s759_s27, %s760_s28  }
  0x33   :  { %751 = dma.done.wait [#allocation3], 128  }
  0x34   :  { %752 = vsyncadd [#allocation3], 4294967168 }
  0x35   :  { %753 = dma.done.wait [#allocation6], 3200  }
  0x36   :  { %754 = vsyncadd [#allocation6], 4294964096  ;;  %v762_v0 = vmov 0.0   ;;  %vm763_vm0 = vmmov 0   ;;  %v637_v1 = vld [vmem:[#allocation5] sm:$0xff]   ;;  %v638_v2 = vld [vmem:[#allocation2] sm:$0xff]  }
  0x37   :  { %563 = vmatprep.subr.bf16.mxu0 %v762_v0  ;;  %565 = vmatprep.mubr.msk.bf16.mxu0 %vm763_vm0, %v762_v0  ;;  %vm80_vm1 = vcmask 130048   ;;  %v639_v3 = vld [vmem:[#allocation7] sm:$0xff]   ;;  %v640_v4 = vld [vmem:[#allocation7 + $0x8] sm:$0xff]   ;;  %v641_v5 = vld [vmem:[#allocation7 + $0x10] sm:$0xff]   ;;  %s764_s8 = smov [#allocation8]  }
  0x38   :  { %569 = vmatprep.subr.bf16.mxu1 %v762_v0  ;;  %585 = vmatprep.mubr.msk.bf16.mxu1 %vm763_vm0, %v762_v0  ;;  %v642_v6 = vld [vmem:[#allocation7 + $0x18] sm:$0xff]   ;;  %v643_v7 = vld [vmem:[#allocation7 + $0x20] sm:$0xff]   ;;  %v644_v8 = vld [vmem:[#allocation7 + $0x28] sm:$0xff]   ;;  %s481_s9 = sshll.u32 %s764_s8, 4  ;;  %s482_s9 = int_to_ptr.vmem [resolvable:$true] %s481_s9 }
  0x39   :  { %564 = vmatpush3.bf16.msra.mxu0 %v637_v1  ;;  %570 = vmatpush3.bf16.msra.mxu1 %v639_v3  ;;  %v645_v9 = vld [vmem:[#allocation7 + $0x30] sm:$0xff]   ;;  %v646_v10 = vld [vmem:[#allocation7 + $0x38] sm:$0xff]   ;;  %v647_v11 = vld [vmem:[#allocation7 + $0x40] sm:$0xff]   ;;  %s729_s10 = scalar_lea.vmem %s482_s9, 128  ;;  %p734_p11 = scmp.lt.s32.totalorder %s482_s9, %s482_s9 }
  0x3a   :  { %589 = vmatprep.subr.bf16.mxu0 %v762_v0  ;;  %571 = vmatprep.subr.bf16.mxu1 %v762_v0  ;;  %v648_v12 = vld [vmem:[#allocation7 + $0x48] sm:$0xff]   ;;  %v649_v13 = vld [vmem:[#allocation7 + $0x50] sm:$0xff]   ;;  %v650_v14 = vld [vmem:[#allocation7 + $0x58] sm:$0xff]   ;;  %p730_p10 = scmp.ne.s32.totalorder %s482_s9, %s729_s10  ;;  %p735_p12 = scmp.lt.s32.totalorder %s729_s10, %s729_s10 }
  0x3b   :  { %v651_v15 = vld [vmem:[#allocation7 + $0x60] sm:$0xff]   ;;  %v652_v16 = vld [vmem:[#allocation7 + $0x68] sm:$0xff]   ;;  %v494_v17 = vld [vmem:[%s905_s3] ss:$0 sm:$0xff] }
  0x3c   :  { %566 = vmatmul.mubr.msk.bf16.vlgmr.msra.gmra.mrb[0].mxu0 %vm80_vm1, %v638_v2  ;;  %v653_v27 = vld [vmem:[#allocation7 + $0x70] sm:$0xff]   ;;  %v654_v28 = vld [vmem:[#allocation7 + $0x78] sm:$0xff]   ;;  %v655_v29 = vld [vmem:[#allocation7 + $0x80] sm:$0xff]   ;;  %p736_p13 = por %p735_p12, %p734_p11 }
  0x3d   :  { %605 = vmatprep.mubr.msk.bf16.mxu0 %vm763_vm0, %v762_v0  ;;  %572 = vmatpush3.bf16.msra.mxu1 %v640_v4  ;;  %v656_v30 = vld [vmem:[#allocation7 + $0x88] sm:$0xff]   ;;  %v657_v31 = vld [vmem:[#allocation7 + $0x90] sm:$0xff]   ;;  %v658_v32 = vld [vmem:[#allocation7 + $0x98] sm:$0xff]  }
  0x3e   :  { %573 = vmatprep.subr.bf16.mxu1 %v762_v0  ;;  %590 = vmatpush3.bf16.msra.mxu0 %v647_v11  ;;  %v659_v33 = vld [vmem:[#allocation7 + $0xa0] sm:$0xff]   ;;  %v660_v34 = vld [vmem:[#allocation7 + $0xa8] sm:$0xff]   ;;  %v498_v35 = vld [vmem:[%s905_s3 + $0x1] ss:$0 sm:$0xff]  ;;  %p737_p0 = pnand %p736_p13, %p730_p10 }
  0x3f   :  { %591 = vmatprep.subr.bf16.mxu0 %v762_v0  ;;  %v661_v45 = vld [vmem:[#allocation7 + $0xb0] sm:$0xff]   ;;  %v662_v46 = vld [vmem:[#allocation7 + $0xb8] sm:$0xff]  }
  0x40   :  { %v507_v47 = vld [vmem:[%s905_s3 + $0x2] ss:$0 sm:$0xff]  ;;  %v516_v57 = vld [vmem:[%s905_s3 + $0x3] ss:$0 sm:$0xff] }
  0x41   :  { %574 = vmatpush3.bf16.msra.mxu1 %v641_v5 }
  0x42   :  { %575 = vmatprep.subr.bf16.mxu1 %v762_v0  ;;  %592 = vmatpush3.bf16.msra.mxu0 %v648_v12 }
  0x43   :  { %593 = vmatprep.subr.bf16.mxu0 %v762_v0 }
  0x45   :  { %576 = vmatpush3.bf16.msra.mxu1 %v642_v6 }
  0x46   :  { %577 = vmatprep.subr.bf16.mxu1 %v762_v0  ;;  %594 = vmatpush3.bf16.msra.mxu0 %v649_v13 }
  0x47   :  { %595 = vmatprep.subr.bf16.mxu0 %v762_v0 }
  0x49   :  { %578 = vmatpush3.bf16.msra.mxu1 %v643_v7 }
  0x4a   :  { %579 = vmatprep.subr.bf16.mxu1 %v762_v0  ;;  %596 = vmatpush3.bf16.msra.mxu0 %v650_v14 }
  0x4b   :  { %597 = vmatprep.subr.bf16.mxu0 %v762_v0 }
  0x4d   :  { %580 = vmatpush3.bf16.msra.mxu1 %v644_v8 }
  0x4e   :  { %581 = vmatprep.subr.bf16.mxu1 %v762_v0  ;;  %598 = vmatpush3.bf16.msra.mxu0 %v651_v15 }
  0x4f   :  { %599 = vmatprep.subr.bf16.mxu0 %v762_v0 }
  0x51   :  { %582 = vmatpush3.bf16.msra.mxu1 %v645_v9 }
  0x52   :  { %583 = vmatprep.subr.bf16.mxu1 %v762_v0  ;;  %600 = vmatpush3.bf16.msra.mxu0 %v652_v16 }
  0x53   :  { %601 = vmatprep.subr.bf16.mxu0 %v762_v0 }
  0x55   :  { %584 = vmatpush3.bf16.msra.mxu1 %v646_v10 }
  0x56   :  { %609 = vmatprep.subr.bf16.mxu1 %v762_v0  ;;  %602 = vmatpush3.bf16.msra.mxu0 %v653_v27 }
  0x57   :  { %603 = vmatprep.subr.bf16.mxu0 %v762_v0 }
  0x5a   :  { %604 = vmatpush3.bf16.msra.mxu0 %v654_v28 }
 0x10f   :  { %v118_v18 = vpop.f32.mrb[0].mxu0 }
 0x110   :  { %v119_v19 = vadd.f32 %v494_v17, %v118_v18  ;;  %v567_v20 = vpop.f32.mrb[1].mxu0 }
 0x111   :  { %v121_v21 = vpop.f32.mrb[2].mxu0 }
 0x112   :  { %v122_v22 = vadd.f32 %v494_v17, %v121_v21  ;;  %v568_v23 = vpop.f32.mrb[3].mxu0  ;;  %v125_v24 = vmax.f32 %v119_v19, 0.0 }
 0x114   :  { %v126_v25 = vmax.f32 %v122_v22, 0.0 }
 0x116   :  { %v127_v26 = vpack.c.bf16 %v126_v25, %v125_v24 }
 0x118   :  { %586 = vmatmul.mubr.bf16.vlgmr.msra.gmra.mrb[0].mxu1 %v127_v26 }
 0x119   :  { %625 = vmatprep.mubr.msk.bf16.mxu1 %vm763_vm0, %v762_v0  ;;  %610 = vmatpush3.bf16.msra.mxu1 %v655_v29 }
 0x11a   :  { %611 = vmatprep.subr.bf16.mxu1 %v762_v0 }
 0x11d   :  { %612 = vmatpush3.bf16.msra.mxu1 %v656_v30 }
 0x11e   :  { %613 = vmatprep.subr.bf16.mxu1 %v762_v0 }
 0x121   :  { %614 = vmatpush3.bf16.msra.mxu1 %v657_v31 }
 0x122   :  { %615 = vmatprep.subr.bf16.mxu1 %v762_v0 }
 0x125   :  { %616 = vmatpush3.bf16.msra.mxu1 %v658_v32 }
 0x126   :  { %617 = vmatprep.subr.bf16.mxu1 %v762_v0 }
 0x129   :  { %618 = vmatpush3.bf16.msra.mxu1 %v659_v33 }
 0x12a   :  { %619 = vmatprep.subr.bf16.mxu1 %v762_v0 }
 0x12d   :  { %620 = vmatpush3.bf16.msra.mxu1 %v660_v34 }
 0x12e   :  { %621 = vmatprep.subr.bf16.mxu1 %v762_v0 }
 0x131   :  { %622 = vmatpush3.bf16.msra.mxu1 %v661_v45 }
 0x132   :  { %623 = vmatprep.subr.bf16.mxu1 %v762_v0 }
 0x135   :  { %624 = vmatpush3.bf16.msra.mxu1 %v662_v46 }
 0x1eb   :  { %v231_v36 = vpop.f32.mrb[0].mxu1 }
 0x1ec   :  { %v232_v37 = vadd.f32 %v498_v35, %v231_v36  ;;  %v587_v38 = vpop.f32.mrb[1].mxu1 }
 0x1ed   :  { %v234_v39 = vpop.f32.mrb[2].mxu1 }
 0x1ee   :  { %v235_v40 = vadd.f32 %v498_v35, %v234_v39  ;;  %v588_v41 = vpop.f32.mrb[3].mxu1  ;;  %v238_v42 = vmax.f32 %v232_v37, 0.0 }
 0x1f0   :  { %v239_v43 = vmax.f32 %v235_v40, 0.0 }
 0x1f2   :  { %v240_v44 = vpack.c.bf16 %v239_v43, %v238_v42 }
 0x1f4   :  { %606 = vmatmul.mubr.bf16.vlgmr.msra.gmra.mrb[4].mxu0 %v240_v44 }
 0x2c7   :  { %v345_v48 = vpop.f32.mrb[4].mxu0 }
 0x2c8   :  { %v346_v49 = vadd.f32 %v507_v47, %v345_v48  ;;  %v607_v50 = vpop.f32.mrb[5].mxu0 }
 0x2c9   :  { %v348_v51 = vpop.f32.mrb[6].mxu0 }
 0x2ca   :  { %v349_v52 = vadd.f32 %v507_v47, %v348_v51  ;;  %v608_v53 = vpop.f32.mrb[7].mxu0  ;;  %v352_v54 = vmax.f32 %v346_v49, 0.0 }
 0x2cc   :  { %v353_v55 = vmax.f32 %v349_v52, 0.0 }
 0x2ce   :  { %v354_v56 = vpack.c.bf16 %v353_v55, %v352_v54 }
 0x2d0   :  { %626 = vmatmul.mubr.bf16.vlgmr.msra.gmra.mrb[4].mxu1 %v354_v56 }
 0x3a3   :  { %v459_v58 = vpop.f32.mrb[4].mxu1 }
 0x3a4   :  { %v627_v59 = vpop.f32.mrb[5].mxu1  ;;  %v460_v61 = vadd.f32 %v516_v57, %v459_v58 }
 0x3a5   :  { %v462_v60 = vpop.f32.mrb[6].mxu1 }
 0x3a6   :  { %v463_v62 = vadd.f32 %v516_v57, %v462_v60  ;;  %v628_v63 = vpop.f32.mrb[7].mxu1 }
 0x3a8   :  { %v532_v0 = vpack.c.bf16 %v463_v62, %v460_v61 }
 0x3aa   :  { %533 = vst [vmem:[#allocation8] sm:$0xff] %v532_v0  }
 0x3ab   :  { %740 = shalt.err (!%p737_p0)
}
 0x3ac   :  { %s741_s12 = scalar_lea.hbm %s906_s4, 128 }
 0x3ad   :  { %p742_p1 = scmp.ne.s32.totalorder %s906_s4, %s741_s12  ;;  %p745_p2 = scmp.lt.u32.totalorder %s741_s12, %s906_s4 }
 0x3af   :  { %p747_p3 = pnand %p745_p2, %p742_p1 }
 0x3b1   :  { %750 = shalt.err (!%p747_p3)
}
 0x3b2   :  { %487 = dma.vmem_to_hbm [thread:$0]  %s482_s9, 128, %s906_s4, [#allocation4], %s759_s27, %s759_s27, %s760_s28  }
 0x3b3   :  { %755 = dma.done.wait [#allocation4], 128  }
 0x3b4   :  { %756 = vsyncadd [#allocation4], 4294967168 }
 0x3b5   :  { %491 = vsyncpa [#allocation3], 1 }
 0x3b6   :  { %492 = vsyncpa [#allocation6], 1 }
 0x3b7   :  { %493 = vsyncpa [#allocation4], 1 }

</bundles_post_ra>
